<compile_context>
chip_gen: v7x
topology: tpu7x:2x2x1
jax: 0.10.0
libtpu: 0.0.40
codegen_flags: <defaults>
</compile_context>

<pallas_src>
import functools

import jax
import jax.numpy as jnp
from jax.experimental import pallas as pl
from jax.experimental.pallas import tpu as pltpu


def se_block_kernel(x_ref, w1_ref, b1_ref, alpha_ref, w2_ref, b2_ref, o_ref,
                    *, fold, hw):
    # x_ref: (Bt, C//fold, fold*hw).  Channel c = k*fold + f lives at row k,
    # lanes [f*hw : (f+1)*hw).
    x = x_ref[...]
    bt, cf = x.shape[0], x.shape[1]
    hidden = w1_ref.shape[1]
    alpha = alpha_ref[0]                          # PReLU scalar (SMEM)
    inv_hw = 1.0 / float(hw)

    # --- squeeze (per-channel mean) + fc1, accumulated per fold slice (VPU) ---
    b1 = b1_ref[...]                              # (1, hidden)
    h = jnp.zeros((bt, hidden), dtype=jnp.float32)
    for f in range(fold):
        xs = x[:, :, f * hw:(f + 1) * hw].astype(jnp.float32)
        y_f = jnp.sum(xs, axis=-1) * inv_hw       # (Bt, Cf) channel means
        w1_f = w1_ref[f]                          # (hidden, Cf)
        h = h + jnp.sum(w1_f[None, :, :] * y_f[:, None, :], axis=-1)
    h = h + b1
    h = jnp.where(h >= 0.0, h, alpha * h)         # PReLU (single shared alpha)

    # --- fc2 + sigmoid per fold slice, then one lane-dense reweight store ---
    b2 = b2_ref[...]                              # (fold, Cf)
    parts = []
    for f in range(fold):
        w2_f = w2_ref[f]                          # (Cf, hidden)
        z_f = jnp.sum(w2_f[None, :, :] * h[:, None, :], axis=-1) + b2[f:f + 1, :]
        e = jnp.exp(-jnp.abs(z_f))                # numerically stable sigmoid
        s_f = jnp.where(z_f >= 0.0, 1.0 / (1.0 + e), e / (1.0 + e))
        parts.append(jnp.broadcast_to(s_f[:, :, None], (bt, cf, hw)))
    scale = parts[0] if fold == 1 else jnp.concatenate(parts, axis=-1)

    o_ref[...] = (x * scale).astype(o_ref.dtype)  # single full-width store


def se_block(x, w1, b1, alpha, w2, b2, *, block_bytes_target=2 << 20):
    """x: (B, C, H, W).  Weights in PyTorch nn.Linear layout:
    w1: (C//r, C), b1: (C//r,), alpha: PReLU scalar, w2: (C, C//r), b2: (C,)."""
    B, C, H, W = x.shape
    HW = H * W
    hidden = w1.shape[0]
    itemsize = jnp.dtype(x.dtype).itemsize

    # Fold adjacent channels so the block's last dim is a multiple of 128
    # (lane-dense stores, contiguous DMA).  Falls back to fold=1 if impossible.
    fold = 1
    for cand in range(1, C + 1):
        if C % cand == 0 and (cand * HW) % 128 == 0:
            fold = cand
            break
    cf = C // fold
    lanes = fold * HW

    # Batch-block: largest divisor of B whose block fits the size target.
    per_batch_bytes = C * HW * itemsize
    bt = 1
    for cand in range(B, 0, -1):
        if B % cand == 0 and cand * per_batch_bytes <= block_bytes_target:
            bt = cand
            break

    # Free (contiguous) reshapes / tiny weight re-layouts done wrapper-side.
    x_fold = x.reshape(B, cf, lanes)
    w1_t = w1.reshape(hidden, cf, fold).transpose(2, 0, 1)   # (fold, hidden, Cf)
    w2_t = w2.reshape(cf, fold, hidden).transpose(1, 0, 2)   # (fold, Cf, hidden)
    b1_2d = b1.reshape(1, hidden).astype(jnp.float32)
    b2_t = b2.reshape(cf, fold).T.astype(jnp.float32)        # (fold, Cf)
    alpha_1d = jnp.asarray(alpha, dtype=jnp.float32).reshape(1)

    kernel = functools.partial(se_block_kernel, fold=fold, hw=HW)

    block_bytes = bt * C * HW * itemsize
    weight_bytes = (w1_t.size + w2_t.size + b1_2d.size + b2_t.size) * 4
    # in + out blocks, double-buffered, plus resident weights and slack.
    vmem_needed = 4 * block_bytes + 2 * weight_bytes + (1 << 20)
    cp = dict(dimension_semantics=("parallel",))
    if vmem_needed > (16 << 20):        # only raise past v5e's scoped default
        cp["vmem_limit_bytes"] = int(vmem_needed)

    out = pl.pallas_call(
        kernel,
        out_shape=jax.ShapeDtypeStruct((B, cf, lanes), x.dtype),
        grid_spec=pltpu.PrefetchScalarGridSpec(
            num_scalar_prefetch=0,
            grid=(B // bt,),
            in_specs=[
                pl.BlockSpec((bt, cf, lanes), lambda b: (b, 0, 0)),     # x block
                pl.BlockSpec((fold, hidden, cf), lambda b: (0, 0, 0)),  # W1
                pl.BlockSpec((1, hidden), lambda b: (0, 0)),            # b1
                pl.BlockSpec((1,), lambda b: (0,),
                             memory_space=pltpu.MemorySpace.SMEM),      # alpha
                pl.BlockSpec((fold, cf, hidden), lambda b: (0, 0, 0)),  # W2
                pl.BlockSpec((fold, cf), lambda b: (0, 0)),             # b2
            ],
            out_specs=pl.BlockSpec((bt, cf, lanes), lambda b: (b, 0, 0)),
        ),
        compiler_params=pltpu.CompilerParams(**cp),
    )(x_fold, w1_t, b1_2d, alpha_1d, w2_t, b2_t)

    return out.reshape(B, C, H, W)


def se_block_reference(x, w1, b1, alpha, w2, b2):
    """Plain-JAX reference mirroring the PyTorch forward."""
    y = jnp.mean(x, axis=(2, 3))                  # (B, C)
    h = y @ w1.T + b1                             # (B, C//r)
    h = jnp.where(h >= 0, h, alpha * h)           # PReLU
    z = h @ w2.T + b2                             # (B, C)
    s = jax.nn.sigmoid(z)
    return x * s[:, :, None, None]


if __name__ == "__main__":
    # Small shapes consistent with the module: channel=32, reduction=16 -> hidden=2
    B, C, H, W = 2, 32, 8, 8
    reduction = 16
    hidden = C // reduction

    key = jax.random.PRNGKey(0)
    kx, kw1, kb1, kw2, kb2 = jax.random.split(key, 5)

    x = jax.random.normal(kx, (B, C, H, W), dtype=jnp.float32)

    # PyTorch-default-style init (uniform +-1/sqrt(fan_in)); PReLU alpha = 0.25.
    bound1 = 1.0 / (C ** 0.5)
    w1 = jax.random.uniform(kw1, (hidden, C), jnp.float32, -bound1, bound1)
    b1 = jax.random.uniform(kb1, (hidden,), jnp.float32, -bound1, bound1)
    bound2 = 1.0 / (hidden ** 0.5)
    w2 = jax.random.uniform(kw2, (C, hidden), jnp.float32, -bound2, bound2)
    b2 = jax.random.uniform(kb2, (C,), jnp.float32, -bound2, bound2)
    alpha = jnp.array(0.25, dtype=jnp.float32)

    out = se_block(x, w1, b1, alpha, w2, b2)
    out = jax.block_until_ready(out)

    ref = se_block_reference(x, w1, b1, alpha, w2, b2)
    assert out.shape == (B, C, H, W)
    assert jnp.allclose(out, ref, atol=1e-5, rtol=1e-5), "mismatch vs reference"

    print("KERNEL_OK")
</pallas_src>

<mosaic_0001>
module attributes {stable_mosaic.version = 11 : i64} {
  func.func @se_block_kernel(%arg0: i32, %arg1: memref<2x16x128xf32, #tpu.memory_space<vmem>>, %arg2: memref<2x2x16xf32, #tpu.memory_space<vmem>>, %arg3: memref<1x2xf32, #tpu.memory_space<vmem>>, %arg4: memref<1xf32, #tpu.memory_space<smem>>, %arg5: memref<2x16x2xf32, #tpu.memory_space<vmem>>, %arg6: memref<2x16xf32, #tpu.memory_space<vmem>>, %arg7: memref<2x16x128xf32, #tpu.memory_space<vmem>>) attributes {dimension_semantics = [#tpu.dimension_semantics<parallel>], iteration_bounds = array<i64: 1>, scalar_prefetch = 0 : i64, scratch_operands = 0 : i64, tpu.core_type = #tpu.core_type<tc>, window_params = [{transform_indices = @transform_0, window_bounds = array<i64: 2, 16, 128>}, {pipeline_mode = #tpu.pipeline_mode<synchronous>, transform_indices = @transform_1, window_bounds = array<i64: 2, 2, 16>}, {pipeline_mode = #tpu.pipeline_mode<synchronous>, transform_indices = @transform_2, window_bounds = array<i64: 1, 2>}, {transform_indices = @transform_3, window_bounds = array<i64: 1>}, {pipeline_mode = #tpu.pipeline_mode<synchronous>, transform_indices = @transform_4, window_bounds = array<i64: 2, 16, 2>}, {pipeline_mode = #tpu.pipeline_mode<synchronous>, transform_indices = @transform_5, window_bounds = array<i64: 2, 16>}, {transform_indices = @transform_6, window_bounds = array<i64: 2, 16, 128>}]} {
    %c0 = arith.constant 0 : index
    %c0_0 = arith.constant 0 : index
    %c0_1 = arith.constant 0 : index
    %0 = vector.load %arg1[%c0, %c0_0, %c0_1] : memref<2x16x128xf32, #tpu.memory_space<vmem>>, vector<2x16x128xf32>
    %c0_2 = arith.constant 0 : index
    %1 = memref.load %arg4[%c0_2] : memref<1xf32, #tpu.memory_space<smem>>
    %c0_3 = arith.constant 0 : index
    %c0_4 = arith.constant 0 : index
    %2 = vector.load %arg3[%c0_3, %c0_4] : memref<1x2xf32, #tpu.memory_space<vmem>>, vector<1x2xf32>
    %cst = arith.constant 0.000000e+00 : f32
    %3 = vector.broadcast %cst : f32 to vector<2x2xf32>
    %4 = vector.extract_strided_slice %0 {offsets = [0, 0, 0], sizes = [2, 16, 64], strides = [1, 1, 1]} : vector<2x16x128xf32> to vector<2x16x64xf32>
    %cst_5 = arith.constant dense<0.000000e+00> : vector<2x16xf32>
    %5 = vector.multi_reduction <add>, %4, %cst_5 [2] : vector<2x16x64xf32> to vector<2x16xf32>
    %cst_6 = arith.constant 1.562500e-02 : f32
    %6 = vector.broadcast %cst_6 : f32 to vector<2x16xf32>
    %7 = arith.mulf %5, %6 : vector<2x16xf32>
    %c0_7 = arith.constant 0 : index
    %c0_8 = arith.constant 0 : index
    %c0_9 = arith.constant 0 : index
    %8 = vector.load %arg2[%c0_7, %c0_8, %c0_9] : memref<2x2x16xf32, #tpu.memory_space<vmem>>, vector<1x2x16xf32>
    %9 = vector.shape_cast %8 : vector<1x2x16xf32> to vector<2x16xf32>
    %10 = vector.shape_cast %9 : vector<2x16xf32> to vector<1x2x16xf32>
    %11 = vector.shape_cast %7 : vector<2x16xf32> to vector<2x1x16xf32>
    %12 = vector.broadcast %10 : vector<1x2x16xf32> to vector<2x2x16xf32>
    %13 = vector.broadcast %11 : vector<2x1x16xf32> to vector<2x2x16xf32>
    %14 = arith.mulf %12, %13 : vector<2x2x16xf32>
    %cst_10 = arith.constant dense<0.000000e+00> : vector<2x2xf32>
    %15 = vector.multi_reduction <add>, %14, %cst_10 [2] : vector<2x2x16xf32> to vector<2x2xf32>
    %16 = arith.addf %3, %15 : vector<2x2xf32>
    %17 = vector.extract_strided_slice %0 {offsets = [0, 0, 64], sizes = [2, 16, 64], strides = [1, 1, 1]} : vector<2x16x128xf32> to vector<2x16x64xf32>
    %cst_11 = arith.constant dense<0.000000e+00> : vector<2x16xf32>
    %18 = vector.multi_reduction <add>, %17, %cst_11 [2] : vector<2x16x64xf32> to vector<2x16xf32>
    %cst_12 = arith.constant 1.562500e-02 : f32
    %19 = vector.broadcast %cst_12 : f32 to vector<2x16xf32>
    %20 = arith.mulf %18, %19 : vector<2x16xf32>
    %c1 = arith.constant 1 : index
    %c0_13 = arith.constant 0 : index
    %c0_14 = arith.constant 0 : index
    %21 = vector.load %arg2[%c1, %c0_13, %c0_14] : memref<2x2x16xf32, #tpu.memory_space<vmem>>, vector<1x2x16xf32>
    %22 = vector.shape_cast %21 : vector<1x2x16xf32> to vector<2x16xf32>
    %23 = vector.shape_cast %22 : vector<2x16xf32> to vector<1x2x16xf32>
    %24 = vector.shape_cast %20 : vector<2x16xf32> to vector<2x1x16xf32>
    %25 = vector.broadcast %23 : vector<1x2x16xf32> to vector<2x2x16xf32>
    %26 = vector.broadcast %24 : vector<2x1x16xf32> to vector<2x2x16xf32>
    %27 = arith.mulf %25, %26 : vector<2x2x16xf32>
    %cst_15 = arith.constant dense<0.000000e+00> : vector<2x2xf32>
    %28 = vector.multi_reduction <add>, %27, %cst_15 [2] : vector<2x2x16xf32> to vector<2x2xf32>
    %29 = arith.addf %16, %28 : vector<2x2xf32>
    %30 = vector.broadcast %2 : vector<1x2xf32> to vector<2x2xf32>
    %31 = arith.addf %29, %30 : vector<2x2xf32>
    %cst_16 = arith.constant 0.000000e+00 : f32
    %32 = vector.broadcast %cst_16 : f32 to vector<2x2xf32>
    %33 = arith.cmpf oge, %31, %32 : vector<2x2xf32>
    %34 = vector.broadcast %1 : f32 to vector<2x2xf32>
    %35 = arith.mulf %34, %31 : vector<2x2xf32>
    %36 = arith.select %33, %31, %35 : vector<2x2xi1>, vector<2x2xf32>
    %c0_17 = arith.constant 0 : index
    %c0_18 = arith.constant 0 : index
    %37 = vector.load %arg6[%c0_17, %c0_18] : memref<2x16xf32, #tpu.memory_space<vmem>>, vector<2x16xf32>
    %c0_19 = arith.constant 0 : index
    %c0_20 = arith.constant 0 : index
    %c0_21 = arith.constant 0 : index
    %38 = vector.load %arg5[%c0_19, %c0_20, %c0_21] : memref<2x16x2xf32, #tpu.memory_space<vmem>>, vector<1x16x2xf32>
    %39 = vector.shape_cast %38 : vector<1x16x2xf32> to vector<16x2xf32>
    %40 = vector.shape_cast %39 : vector<16x2xf32> to vector<1x16x2xf32>
    %41 = vector.shape_cast %36 : vector<2x2xf32> to vector<2x1x2xf32>
    %42 = vector.broadcast %40 : vector<1x16x2xf32> to vector<2x16x2xf32>
    %43 = vector.broadcast %41 : vector<2x1x2xf32> to vector<2x16x2xf32>
    %44 = arith.mulf %42, %43 : vector<2x16x2xf32>
    %cst_22 = arith.constant dense<0.000000e+00> : vector<2x16xf32>
    %45 = vector.multi_reduction <add>, %44, %cst_22 [2] : vector<2x16x2xf32> to vector<2x16xf32>
    %46 = vector.extract_strided_slice %37 {offsets = [0, 0], sizes = [1, 16], strides = [1, 1]} : vector<2x16xf32> to vector<1x16xf32>
    %47 = vector.broadcast %46 : vector<1x16xf32> to vector<2x16xf32>
    %48 = arith.addf %45, %47 : vector<2x16xf32>
    %49 = math.absf %48 : vector<2x16xf32>
    %cst_23 = arith.constant 0.000000e+00 : f32
    %50 = vector.broadcast %cst_23 : f32 to vector<2x16xf32>
    %51 = arith.subf %50, %49 : vector<2x16xf32>
    %52 = math.exp %51 : vector<2x16xf32>
    %cst_24 = arith.constant 0.000000e+00 : f32
    %53 = vector.broadcast %cst_24 : f32 to vector<2x16xf32>
    %54 = arith.cmpf oge, %48, %53 : vector<2x16xf32>
    %cst_25 = arith.constant 1.000000e+00 : f32
    %55 = vector.broadcast %cst_25 : f32 to vector<2x16xf32>
    %56 = arith.addf %55, %52 : vector<2x16xf32>
    %cst_26 = arith.constant 1.000000e+00 : f32
    %57 = vector.broadcast %cst_26 : f32 to vector<2x16xf32>
    %58 = arith.divf %57, %56 : vector<2x16xf32>
    %cst_27 = arith.constant 1.000000e+00 : f32
    %59 = vector.broadcast %cst_27 : f32 to vector<2x16xf32>
    %60 = arith.addf %59, %52 : vector<2x16xf32>
    %61 = arith.divf %52, %60 : vector<2x16xf32>
    %62 = arith.select %54, %58, %61 : vector<2x16xi1>, vector<2x16xf32>
    %63 = vector.shape_cast %62 : vector<2x16xf32> to vector<2x16x1xf32>
    %64 = vector.shape_cast %63 : vector<2x16x1xf32> to vector<2x16x1xf32>
    %65 = vector.broadcast %64 : vector<2x16x1xf32> to vector<2x16x64xf32>
    %c1_28 = arith.constant 1 : index
    %c0_29 = arith.constant 0 : index
    %c0_30 = arith.constant 0 : index
    %66 = vector.load %arg5[%c1_28, %c0_29, %c0_30] : memref<2x16x2xf32, #tpu.memory_space<vmem>>, vector<1x16x2xf32>
    %67 = vector.shape_cast %66 : vector<1x16x2xf32> to vector<16x2xf32>
    %68 = vector.shape_cast %67 : vector<16x2xf32> to vector<1x16x2xf32>
    %69 = vector.shape_cast %36 : vector<2x2xf32> to vector<2x1x2xf32>
    %70 = vector.broadcast %68 : vector<1x16x2xf32> to vector<2x16x2xf32>
    %71 = vector.broadcast %69 : vector<2x1x2xf32> to vector<2x16x2xf32>
    %72 = arith.mulf %70, %71 : vector<2x16x2xf32>
    %cst_31 = arith.constant dense<0.000000e+00> : vector<2x16xf32>
    %73 = vector.multi_reduction <add>, %72, %cst_31 [2] : vector<2x16x2xf32> to vector<2x16xf32>
    %74 = vector.extract_strided_slice %37 {offsets = [1, 0], sizes = [1, 16], strides = [1, 1]} : vector<2x16xf32> to vector<1x16xf32>
    %75 = vector.broadcast %74 : vector<1x16xf32> to vector<2x16xf32>
    %76 = arith.addf %73, %75 : vector<2x16xf32>
    %77 = math.absf %76 : vector<2x16xf32>
    %cst_32 = arith.constant 0.000000e+00 : f32
    %78 = vector.broadcast %cst_32 : f32 to vector<2x16xf32>
    %79 = arith.subf %78, %77 : vector<2x16xf32>
    %80 = math.exp %79 : vector<2x16xf32>
    %cst_33 = arith.constant 0.000000e+00 : f32
    %81 = vector.broadcast %cst_33 : f32 to vector<2x16xf32>
    %82 = arith.cmpf oge, %76, %81 : vector<2x16xf32>
    %cst_34 = arith.constant 1.000000e+00 : f32
    %83 = vector.broadcast %cst_34 : f32 to vector<2x16xf32>
    %84 = arith.addf %83, %80 : vector<2x16xf32>
    %cst_35 = arith.constant 1.000000e+00 : f32
    %85 = vector.broadcast %cst_35 : f32 to vector<2x16xf32>
    %86 = arith.divf %85, %84 : vector<2x16xf32>
    %cst_36 = arith.constant 1.000000e+00 : f32
    %87 = vector.broadcast %cst_36 : f32 to vector<2x16xf32>
    %88 = arith.addf %87, %80 : vector<2x16xf32>
    %89 = arith.divf %80, %88 : vector<2x16xf32>
    %90 = arith.select %82, %86, %89 : vector<2x16xi1>, vector<2x16xf32>
    %91 = vector.shape_cast %90 : vector<2x16xf32> to vector<2x16x1xf32>
    %92 = vector.shape_cast %91 : vector<2x16x1xf32> to vector<2x16x1xf32>
    %93 = vector.broadcast %92 : vector<2x16x1xf32> to vector<2x16x64xf32>
    %94 = tpu.concatenate %65, %93 in 2 : vector<2x16x64xf32>, vector<2x16x64xf32> -> vector<2x16x128xf32>
    %95 = arith.mulf %0, %94 : vector<2x16x128xf32>
    %c0_37 = arith.constant 0 : index
    %c0_38 = arith.constant 0 : index
    %c0_39 = arith.constant 0 : index
    %96 = vector.load %arg7[%c0_37, %c0_38, %c0_39] : memref<2x16x128xf32, #tpu.memory_space<vmem>>, vector<2x16x128xf32>
    tpu.vector_store %arg7[%c0_37, %c0_38, %c0_39], %95 {strides = array<i32>} : memref<2x16x128xf32, #tpu.memory_space<vmem>>, vector<2x16x128xf32>,
    return
  }
  func.func @transform_0(%arg0: i32) -> (i32, i32, i32) {
    %c0_i32 = arith.constant 0 : i32
    %c0_i32_0 = arith.constant 0 : i32
    %c0_i32_1 = arith.constant 0 : i32
    return %arg0, %c0_i32, %c0_i32_0 : i32, i32, i32
  }
  func.func @transform_1(%arg0: i32) -> (i32, i32, i32) {
    %c0_i32 = arith.constant 0 : i32
    %c0_i32_0 = arith.constant 0 : i32
    %c0_i32_1 = arith.constant 0 : i32
    %c0_i32_2 = arith.constant 0 : i32
    return %c0_i32, %c0_i32_0, %c0_i32_1 : i32, i32, i32
  }
  func.func @transform_2(%arg0: i32) -> (i32, i32) {
    %c0_i32 = arith.constant 0 : i32
    %c0_i32_0 = arith.constant 0 : i32
    %c0_i32_1 = arith.constant 0 : i32
    return %c0_i32, %c0_i32_0 : i32, i32
  }
  func.func @transform_3(%arg0: i32) -> i32 {
    %c0_i32 = arith.constant 0 : i32
    %c0_i32_0 = arith.constant 0 : i32
    return %c0_i32 : i32
  }
  func.func @transform_4(%arg0: i32) -> (i32, i32, i32) {
    %c0_i32 = arith.constant 0 : i32
    %c0_i32_0 = arith.constant 0 : i32
    %c0_i32_1 = arith.constant 0 : i32
    %c0_i32_2 = arith.constant 0 : i32
    return %c0_i32, %c0_i32_0, %c0_i32_1 : i32, i32, i32
  }
  func.func @transform_5(%arg0: i32) -> (i32, i32) {
    %c0_i32 = arith.constant 0 : i32
    %c0_i32_0 = arith.constant 0 : i32
    %c0_i32_1 = arith.constant 0 : i32
    return %c0_i32, %c0_i32_0 : i32, i32
  }
  func.func @transform_6(%arg0: i32) -> (i32, i32, i32) {
    %c0_i32 = arith.constant 0 : i32
    %c0_i32_0 = arith.constant 0 : i32
    %c0_i32_1 = arith.constant 0 : i32
    return %arg0, %c0_i32, %c0_i32_0 : i32, i32, i32
  }
}

</mosaic_0001>

<bundles_post_ra>
// kernel: tpu_custom_call.1
= control target key start
LH: loop header
LB: loop body
LE: loop exit
PB: predicated region body
PF: predicated region fallthrough
CT: control target
= control target key end

     0   :  { %s500_s25 = smov 64   ;;  %s677_s0 = inlined_call_operand.vmem [shape: f32[2,16,128], index: 0, kind: input, shape index: {}]   ;;  %s678_s1 = inlined_call_operand.vmem [shape: f32[2,2,16], index: 1, kind: input, shape index: {}]   ;;  %s679_s2 = inlined_call_operand.vmem [shape: f32[1,2], index: 2, kind: input, shape index: {}]   ;;  %s680_s3 = inlined_call_operand.<no memory space> [shape: f32[1], index: 3, kind: input, shape index: {}]   ;;  %s681_s4 = inlined_call_operand.vmem [shape: f32[2,16,2], index: 4, kind: input, shape index: {}]   ;;  %s682_s5 = inlined_call_operand.vmem [shape: f32[2,16], index: 5, kind: input, shape index: {}]   ;;  %s683_s6 = inlined_call_operand.hbm [shape: f32[2,16,128], index: 6, kind: output, shape index: {}]  }
   0x1   :  { %v543_v0 = vld [vmem:[%s677_s0] sm:$0xff]  ;;  %v548_v1 = vld [vmem:[%s677_s0 + $0x10] sm:$0xff] }
   0x2   :  { %92 = vrot.lane.b32.xlu0 %v543_v0, %s500_s25  ;;  %96 = vrot.lane.b32.xlu1 %v548_v1, %s500_s25 }
   0x3   :  { %12 = vsyncpa [#allocation4], 0  ;;  %v555_v2 = vld [vmem:[%s677_s0 + $0x8] sm:$0xff]  ;;  %v560_v3 = vld [vmem:[%s677_s0 + $0x18] sm:$0xff]  ;;  %vm31_vm0 = vcmask 523264   ;;  %v53_v16 = vlaneseq  ;;  %vm64_vm1 = vcmask 130112  }
   0x4   :  { %v32_v4 = vsel %vm31_vm0, %v543_v0, 0.0  ;;  %v38_v5 = vsel %vm31_vm0, %v548_v1, 0.0  ;;  %v35_v6 = vsel %vm31_vm0, %v555_v2, 0.0  ;;  %v41_v7 = vsel %vm31_vm0, %v560_v3, 0.0  ;;  %v48_v31 = vld [vmem:[%s678_s1] sm:$0x3] }
   0x5   :  { %v54_v17 = vand.u32 127, %v53_v16  ;;  %v576_v18 = vshrl.u32 %v53_v16, 7  ;;  %vm79_vm2 = vcmask 123904   ;;  %v433_v49 = vld [vmem:[%s678_s1 + $0x2] sm:$0x3]  ;;  %v501_v61 = vmov 0  }
   0x6   :  { %94 = vrot.lane.b32.xlu0 %v555_v2, %s500_s25  ;;  %98 = vrot.lane.b32.xlu1 %v560_v3, %s500_s25  ;;  %v434_v60 = vld [vmem:[%s679_s2] ss:$0 sm:$0xff]  ;;  %vm217_vm5 = vcmask 15360  }
   0x7   :  { %v59_v20 = vadd.s32 4294967288, %v54_v17  ;;  %v579_v21 = vsub.s32 %v54_v17, %v576_v18  ;;  %442 = vset.pattern.permute.xlu0 %v501_v61  ;;  %443 = vset.pattern.permute.xlu1 %v501_v61  ;;  %v174_v16 = vld [vmem:[%s682_s5] sm:$0x3] }
   0x9   :  { %v62_v23 = vsub.s32 %v59_v20, %v576_v18 }
  0x25   :  { %33 = vadd.xlane.f32.xlu0 %v32_v4 }
  0x29   :  { %39 = vadd.xlane.f32.xlu0 %v38_v5 }
  0x2a   :  { %36 = vadd.xlane.f32.xlu1 %v35_v6 }
  0x2d   :  { %42 = vadd.xlane.f32.xlu0 %v41_v7 }
  0x74   :  { %v93_v8 = vpop.permute.xlu0 %92  ;;  %v97_v9 = vpop.permute.xlu1 %96 }
  0x75   :  { %v104_v10 = vsel %vm31_vm0, %v93_v8, 0.0  ;;  %v110_v11 = vsel %vm31_vm0, %v97_v9, 0.0  ;;  %v169_v8 = vstv %s680_s3 }
  0x76   :  { %105 = vadd.xlane.f32.xlu1 %v104_v10 }
  0x78   :  { %v95_v12 = vpop.permute.xlu0 %94  ;;  %v99_v13 = vpop.permute.xlu1 %98 }
  0x79   :  { %v107_v14 = vsel %vm31_vm0, %v95_v12, 0.0  ;;  %v113_v15 = vsel %vm31_vm0, %v99_v13, 0.0  ;;  %v232_v13 = vsub.s32 0, %v576_v18 }
  0x7a   :  { %108 = vadd.xlane.f32.xlu0 %v107_v14  ;;  %111 = vadd.xlane.f32.xlu1 %v110_v11 }
  0x7e   :  { %114 = vadd.xlane.f32.xlu0 %v113_v15 }
  0xb2   :  { %v34_v19 = vpop.xlane.xlu0 %33 }
  0xb3   :  { %v44_v22 = vmul.f32 0.015625, %v34_v19  ;;  %v233_v19 = vrot.slane %v174_v16, %v232_v13 }
  0xb5   :  { %v58_v27 = vrot.slane %v44_v22, %v579_v21  ;;  %v176_v22 = vld [vmem:[%s681_s4 + $0x8] sm:$0xff] }
  0xb6   :  { %v40_v24 = vpop.xlane.xlu0 %39 }
  0xb7   :  { %v37_v25 = vpop.xlane.xlu1 %36  ;;  %v46_v26 = vmul.f32 0.015625, %v40_v24 }
  0xb8   :  { %v45_v28 = vmul.f32 0.015625, %v37_v25 }
  0xb9   :  { %v69_v32 = vrot.slane %v46_v26, %v579_v21 }
  0xba   :  { %v63_v29 = vrot.slane %v45_v28, %v62_v23  ;;  %v43_v30 = vpop.xlane.xlu0 %42 }
  0xbb   :  { %v47_v33 = vmul.f32 0.015625, %v43_v30 }
  0xbc   :  { %v65_v34 = vsel %vm64_vm1, %v63_v29, %v58_v27 }
  0xbd   :  { %v73_v35 = vrot.slane %v47_v33, %v62_v23  ;;  %v77_v36 = vmul.f32 %v65_v34, %v48_v31  ;;  %v435_v34 = vld [vmem:[%s681_s4 + $0x10] sm:$0xff] }
  0xbf   :  { %v80_v37 = vsel %vm79_vm2, %v77_v36, 0.0  ;;  %v74_v38 = vsel %vm64_vm1, %v73_v35, %v69_v32  ;;  %v436_v36 = vld [vmem:[%s681_s4 + $0x18] sm:$0xff] }
  0xc0   :  { %81 = vadd.xlane.f32.xlu1 %v80_v37  ;;  %v78_v39 = vmul.f32 %v74_v38, %v48_v31 }
  0xc2   :  { %v83_v40 = vsel %vm79_vm2, %v78_v39, 0.0  ;;  %v329_v39 = vsub.s32 1, %v576_v18 }
  0xc3   :  { %84 = vadd.xlane.f32.xlu0 %v83_v40 }
 0x103   :  { %v106_v41 = vpop.xlane.xlu1 %105 }
 0x104   :  { %v116_v42 = vmul.f32 0.015625, %v106_v41 }
 0x106   :  { %v129_v46 = vrot.slane %v116_v42, %v579_v21  ;;  %v330_v42 = vrot.slane %v174_v16, %v329_v39 }
 0x107   :  { %v109_v43 = vpop.xlane.xlu0 %108  ;;  %v112_v44 = vpop.xlane.xlu1 %111 }
 0x108   :  { %v117_v45 = vmul.f32 0.015625, %v109_v43  ;;  %v118_v48 = vmul.f32 0.015625, %v112_v44 }
 0x10a   :  { %v133_v47 = vrot.slane %v117_v45, %v62_v23  ;;  %v138_v54 = vrot.slane %v118_v48, %v579_v21 }
 0x10b   :  { %v115_v50 = vpop.xlane.xlu0 %114 }
 0x10c   :  { %v119_v51 = vmul.f32 0.015625, %v115_v50  ;;  %v134_v52 = vsel %vm64_vm1, %v133_v47, %v129_v46 }
 0x10d   :  { %v146_v53 = vmul.f32 %v433_v49, %v134_v52 }
 0x10e   :  { %v142_v55 = vrot.slane %v119_v51, %v62_v23  ;;  %v175_v23 = vld [vmem:[%s681_s4] sm:$0xff]  ;;  %s502_s4 = smov [#allocation3]  }
 0x10f   :  { %v148_v56 = vsel %vm79_vm2, %v146_v53, 0.0  ;;  %s422_s19 = sshll.u32 %s502_s4, 4  ;;  %s423_s19 = int_to_ptr.vmem [resolvable:$true] %s422_s19 }
 0x110   :  { %149 = vadd.xlane.f32.xlu1 %v148_v56  ;;  %v143_v57 = vsel %vm64_vm1, %v142_v55, %v138_v54  ;;  %s476_s20 = scalar_lea.vmem %s423_s19, 512  ;;  %p481_p1 = scmp.lt.s32.totalorder %s423_s19, %s423_s19 }
 0x111   :  { %v147_v58 = vmul.f32 %v433_v49, %v143_v57  ;;  %p477_p0 = scmp.ne.s32.totalorder %s423_s19, %s476_s20  ;;  %p482_p2 = scmp.lt.s32.totalorder %s476_s20, %s476_s20 }
 0x113   :  { %v151_v59 = vsel %vm79_vm2, %v147_v58, 0.0  ;;  %p483_p3 = por %p482_p2, %p481_p1 }
 0x114   :  { %152 = vadd.xlane.f32.xlu0 %v151_v59 }
 0x115   :  { %p484_p4 = pnand %p483_p3, %p477_p0 }
 0x121   :  { %162 = vbcast.lane.b32.xlu1 %v434_v60, 256 }
 0x14d   :  { %v82_v62 = vpop.xlane.xlu1 %81 }
 0x150   :  { %v85_v63 = vpop.xlane.xlu0 %84 }
 0x19d   :  { %v150_v4 = vpop.xlane.xlu1 %149 }
 0x19e   :  { %v154_v5 = vadd.f32 %v150_v4, %v82_v62 }
 0x1a1   :  { %v163_v6 = vpop.permute.xlu1 %162  ;;  %v153_v7 = vpop.xlane.xlu0 %152 }
 0x1a2   :  { %v165_v9 = vadd.f32 %v163_v6, %v154_v5  ;;  %v155_v10 = vadd.f32 %v153_v7, %v85_v63 }
 0x1a4   :  { %v166_v11 = vadd.f32 %v163_v6, %v155_v10  ;;  %vm167_vm3 = vcmp.ge.f32.partialorder %v165_v9, 0.0  ;;  %v170_v12 = vmul.f32 %v169_v8, %v165_v9 }
 0x1a6   :  { %v172_v14 = vsel %vm167_vm3, %v165_v9, %v170_v12  ;;  %vm168_vm4 = vcmp.ge.f32.partialorder %v166_v11, 0.0  ;;  %v171_v15 = vmul.f32 %v169_v8, %v166_v11 }
 0x1a7   :  { %180 = vperm.xlu0 %442, %v172_v14  }
 0x1a8   :  { %v173_v17 = vsel %vm168_vm4, %v166_v11, %v171_v15 }
 0x1a9   :  { %183 = vperm.xlu1 %443, %v173_v17  }
 0x1ab   :  { %236 = vbcast.lane.b32.xlu0 %v233_v19, 256 }
 0x1ad   :  { %240 = vbcast.lane.b32.xlu1 %v233_v19, 264 }
 0x226   :  { %v181_v20 = vpop.permute.xlu0 %180 }
 0x227   :  { %v188_v24 = vrot.slane %v181_v20, %v579_v21 }
 0x228   :  { %v184_v25 = vpop.permute.xlu1 %183 }
 0x229   :  { %v192_v26 = vrot.slane %v184_v25, %v579_v21  ;;  %v214_v27 = vmul.f32 %v188_v24, %v176_v22  ;;  %v213_v28 = vmul.f32 %v188_v24, %v175_v23  ;;  %v311_v21 = vmul.f32 %v435_v34, %v188_v24 }
 0x22a   :  { %v312_v38 = vmul.f32 %v436_v36, %v188_v24  ;;  %v237_v47 = vpop.permute.xlu0 %236 }
 0x22b   :  { %v221_v29 = vsel %vm217_vm5, %v214_v27, 0.0  ;;  %v218_v30 = vsel %vm217_vm5, %v213_v28, 0.0  ;;  %v215_v31 = vmul.f32 %v192_v26, %v175_v23  ;;  %v216_v33 = vmul.f32 %v192_v26, %v176_v22 }
 0x22c   :  { %222 = vadd.xlane.f32.xlu0 %v221_v29  ;;  %219 = vadd.xlane.f32.xlu1 %v218_v30  ;;  %v315_v37 = vsel %vm217_vm5, %v311_v21, 0.0  ;;  %v318_v40 = vsel %vm217_vm5, %v312_v38, 0.0  ;;  %v313_v41 = vmul.f32 %v435_v34, %v192_v26  ;;  %v314_v44 = vmul.f32 %v436_v36, %v192_v26  ;;  %v241_v46 = vpop.permute.xlu1 %240 }
 0x22d   :  { %v224_v32 = vsel %vm217_vm5, %v215_v31, 0.0  ;;  %v227_v35 = vsel %vm217_vm5, %v216_v33, 0.0 }
 0x22e   :  { %v321_v43 = vsel %vm217_vm5, %v313_v41, 0.0  ;;  %v324_v45 = vsel %vm217_vm5, %v314_v44, 0.0 }
 0x230   :  { %225 = vadd.xlane.f32.xlu1 %v224_v32 }
 0x234   :  { %228 = vadd.xlane.f32.xlu1 %v227_v35 }
 0x238   :  { %316 = vadd.xlane.f32.xlu1 %v315_v37 }
 0x23c   :  { %319 = vadd.xlane.f32.xlu1 %v318_v40 }
 0x240   :  { %322 = vadd.xlane.f32.xlu1 %v321_v43 }
 0x242   :  { %337 = vbcast.lane.b32.xlu0 %v330_v42, 264 }
 0x244   :  { %325 = vadd.xlane.f32.xlu1 %v324_v45 }
 0x255   :  { %333 = vbcast.lane.b32.xlu1 %v330_v42, 256 }
 0x2b9   :  { %v220_v48 = vpop.xlane.xlu1 %219  ;;  %v223_v49 = vpop.xlane.xlu0 %222 }
 0x2ba   :  { %v633_v50 = vadd.f32 %v237_v47, %v220_v48  ;;  %v635_v18 = vadd.f32 %v241_v46, %v223_v49 }
 0x2bc   :  { %v248_v51 = vand.u32 2147483647, %v633_v50  ;;  %v249_v52 = vand.u32 2147483647, %v635_v18  ;;  %vm264_vm6 = vcmp.ge.f32.partialorder %v633_v50, 0.0  ;;  %vm265_vm7 = vcmp.ge.f32.partialorder %v635_v18, 0.0 }
 0x2bd   :  { %v226_v53 = vpop.xlane.xlu1 %225  ;;  %v338_v7 = vpop.permute.xlu0 %337 }
 0x2be   :  { %v252_v54 = vsub.f32 0.0, %v248_v51  ;;  %v253_v55 = vsub.f32 0.0, %v249_v52  ;;  %v639_v56 = vadd.f32 %v237_v47, %v226_v53 }
 0x2c0   :  { %v256_v57 = vmul.f32 1.442695, %v252_v54  ;;  %v258_v58 = vmul.f32 1.442695, %v253_v55  ;;  %v250_v59 = vand.u32 2147483647, %v639_v56 }
 0x2c1   :  { %v229_v60 = vpop.xlane.xlu1 %228  ;;  %vm266_vm8 = vcmp.ge.f32.partialorder %v639_v56, 0.0 }
 0x2c2   :  { %444 = vpow2.f32 %v256_v57  ;;  %v254_v61 = vsub.f32 0.0, %v250_v59  ;;  %v642_v62 = vadd.f32 %v241_v46, %v229_v60 }
 0x2c3   :  { %446 = vpow2.f32 %v258_v58 }
 0x2c4   :  { %v260_v63 = vmul.f32 1.442695, %v254_v61  ;;  %v251_v4 = vand.u32 2147483647, %v642_v62  ;;  %vm267_vm9 = vcmp.ge.f32.partialorder %v642_v62, 0.0 }
 0x2c5   :  { %v317_v5 = vpop.xlane.xlu1 %316 }
 0x2c6   :  { %448 = vpow2.f32 %v260_v63  ;;  %v255_v6 = vsub.f32 0.0, %v251_v4 }
 0x2c8   :  { %v262_v8 = vmul.f32 1.442695, %v255_v6 }
 0x2c9   :  { %v320_v9 = vpop.xlane.xlu1 %319 }
 0x2ca   :  { %450 = vpow2.f32 %v262_v8  ;;  %v645_v10 = vadd.f32 %v338_v7, %v320_v9 }
 0x2cc   :  { %v445_v11 = vpop.eup %444  ;;  %v346_v12 = vand.u32 2147483647, %v645_v10  ;;  %vm362_vm10 = vcmp.ge.f32.partialorder %v645_v10, 0.0 }
 0x2cd   :  { %v447_v13 = vpop.eup %446  ;;  %v268_v14 = vadd.f32 1.0, %v445_v11  ;;  %v323_v15 = vpop.xlane.xlu1 %322 }
 0x2ce   :  { %v269_v16 = vadd.f32 1.0, %v447_v13  ;;  %v350_v17 = vsub.f32 0.0, %v346_v12 }
 0x2cf   :  { %452 = vrcp.f32 %v268_v14 }
 0x2d0   :  { %v449_v19 = vpop.eup %448  ;;  %454 = vrcp.f32 %v269_v16  ;;  %v355_v20 = vmul.f32 1.442695, %v350_v17 }
 0x2d1   :  { %v270_v22 = vadd.f32 1.0, %v449_v19  ;;  %v326_v23 = vpop.xlane.xlu1 %325 }
 0x2d2   :  { %456 = vpow2.f32 %v355_v20  ;;  %v344_v24 = vadd.f32 %v338_v7, %v326_v23 }
 0x2d3   :  { %458 = vrcp.f32 %v270_v22 }
 0x2d4   :  { %v451_v25 = vpop.eup %450  ;;  %v348_v26 = vand.u32 2147483647, %v344_v24  ;;  %vm364_vm11 = vcmp.ge.f32.partialorder %v344_v24, 0.0 }
 0x2d5   :  { %v271_v27 = vadd.f32 1.0, %v451_v25  ;;  %v334_v28 = vpop.permute.xlu1 %333 }
 0x2d6   :  { %v352_v29 = vsub.f32 0.0, %v348_v26  ;;  %v341_v30 = vadd.f32 %v334_v28, %v317_v5  ;;  %v648_v31 = vadd.f32 %v334_v28, %v323_v15 }
 0x2d7   :  { %460 = vrcp.f32 %v271_v27 }
 0x2d8   :  { %v359_v32 = vmul.f32 1.442695, %v352_v29  ;;  %v345_v33 = vand.u32 2147483647, %v341_v30  ;;  %v347_v34 = vand.u32 2147483647, %v648_v31 }
 0x2d9   :  { %v453_v35 = vpop.eup %452  ;;  %vm361_vm12 = vcmp.ge.f32.partialorder %v341_v30, 0.0  ;;  %vm363_vm13 = vcmp.ge.f32.partialorder %v648_v31, 0.0 }
 0x2da   :  { %v455_v21 = vpop.eup %454  ;;  %462 = vpow2.f32 %v359_v32  ;;  %v349_v36 = vsub.f32 0.0, %v345_v33  ;;  %v351_v37 = vsub.f32 0.0, %v347_v34  ;;  %v280_v38 = vmul.f32 %v453_v35, %v445_v11 }
 0x2db   :  { %v281_v39 = vmul.f32 %v455_v21, %v447_v13 }
 0x2dc   :  { %v457_v40 = vpop.eup %456  ;;  %v353_v41 = vmul.f32 1.442695, %v349_v36  ;;  %v357_v42 = vmul.f32 1.442695, %v351_v37  ;;  %v284_v43 = vsel %vm264_vm6, %v453_v35, %v280_v38 }
 0x2dd   :  { %v459_v44 = vpop.eup %458  ;;  %v366_v45 = vadd.f32 1.0, %v457_v40  ;;  %290 = vperm.xlu1 %443, %v284_v43   ;;  %v285_v46 = vsel %vm265_vm7, %v455_v21, %v281_v39 }
 0x2de   :  { %464 = vpow2.f32 %v353_v41  ;;  %295 = vperm.xlu0 %442, %v285_v46   ;;  %v282_v47 = vmul.f32 %v459_v44, %v449_v19 }
 0x2df   :  { %466 = vrcp.f32 %v366_v45 }
 0x2e0   :  { %468 = vpow2.f32 %v357_v42  ;;  %v286_v48 = vsel %vm266_vm8, %v459_v44, %v282_v47 }
 0x2e1   :  { %v461_v49 = vpop.eup %460  ;;  %300 = vperm.xlu1 %443, %v286_v48  }
 0x2e2   :  { %v283_v50 = vmul.f32 %v461_v49, %v451_v25 }
 0x2e4   :  { %v463_v18 = vpop.eup %462  ;;  %v287_v51 = vsel %vm267_vm9, %v461_v49, %v283_v50 }
 0x2e5   :  { %v368_v52 = vadd.f32 1.0, %v463_v18  ;;  %305 = vperm.xlu0 %442, %v287_v51  }
 0x2e7   :  { %470 = vrcp.f32 %v368_v52 }
 0x2e8   :  { %v465_v53 = vpop.eup %464 }
 0x2e9   :  { %v467_v54 = vpop.eup %466  ;;  %v365_v55 = vadd.f32 1.0, %v465_v53 }
 0x2ea   :  { %v469_v57 = vpop.eup %468  ;;  %v378_v58 = vmul.f32 %v467_v54, %v457_v40 }
 0x2eb   :  { %v367_v56 = vadd.f32 1.0, %v469_v57  ;;  %472 = vrcp.f32 %v365_v55 }
 0x2ec   :  { %v382_v59 = vsel %vm362_vm10, %v467_v54, %v378_v58 }
 0x2ed   :  { %474 = vrcp.f32 %v367_v56  ;;  %392 = vperm.xlu0 %442, %v382_v59  }
 0x2f1   :  { %v471_v60 = vpop.eup %470 }
 0x2f2   :  { %v380_v61 = vmul.f32 %v471_v60, %v463_v18 }
 0x2f4   :  { %v384_v62 = vsel %vm364_vm11, %v471_v60, %v380_v61 }
 0x2f5   :  { %v473_v63 = vpop.eup %472  ;;  %402 = vperm.xlu0 %442, %v384_v62  }
 0x2f6   :  { %v377_v4 = vmul.f32 %v473_v63, %v465_v53 }
 0x2f7   :  { %v475_v5 = vpop.eup %474 }
 0x2f8   :  { %v381_v6 = vsel %vm361_vm12, %v473_v63, %v377_v4  ;;  %v379_v7 = vmul.f32 %v475_v5, %v469_v57 }
 0x2f9   :  { %387 = vperm.xlu1 %443, %v381_v6  }
 0x2fa   :  { %v383_v8 = vsel %vm363_vm13, %v475_v5, %v379_v7 }
 0x2fd   :  { %397 = vperm.xlu1 %443, %v383_v8  }
 0x35c   :  { %v291_v13 = vpop.permute.xlu1 %290 }
 0x35d   :  { %v296_v9 = vpop.permute.xlu0 %295 }
 0x360   :  { %v301_v15 = vpop.permute.xlu1 %300 }
 0x364   :  { %v306_v10 = vpop.permute.xlu0 %305 }
 0x36c   :  { %v393_v11 = vpop.permute.xlu0 %392 }
 0x36d   :  { %v406_v12 = vsel %vm31_vm0, %v296_v9, %v393_v11 }
 0x36e   :  { %v410_v14 = vmul.f32 %v406_v12, %v555_v2 }
 0x370   :  { %414 = vst [vmem:[#allocation3 + $0x8] sm:$0xff] %v410_v14 }
 0x374   :  { %v403_v16 = vpop.permute.xlu0 %402 }
 0x375   :  { %v408_v17 = vsel %vm31_vm0, %v306_v10, %v403_v16 }
 0x376   :  { %v412_v19 = vmul.f32 %v408_v17, %v560_v3 }
 0x378   :  { %416 = vst [vmem:[#allocation3 + $0x18] sm:$0xff] %v412_v19  ;;  %v388_v20 = vpop.permute.xlu1 %387 }
 0x379   :  { %v405_v22 = vsel %vm31_vm0, %v291_v13, %v388_v20 }
 0x37a   :  { %v409_v23 = vmul.f32 %v405_v22, %v543_v0 }
 0x37c   :  { %413 = vst [vmem:[#allocation3] sm:$0xff] %v409_v23  ;;  %v398_v24 = vpop.permute.xlu1 %397 }
 0x37d   :  { %v407_v25 = vsel %vm31_vm0, %v301_v15, %v398_v24 }
 0x37e   :  { %v411_v2 = vmul.f32 %v407_v25, %v548_v1 }
 0x380   :  { %415 = vst [vmem:[#allocation3 + $0x10] sm:$0xff] %v411_v2 }
 0x381   :  { %487 = shalt.err (!%p484_p4)
}
 0x382   :  { %s488_s23 = scalar_lea.hbm %s683_s6, 512 }
 0x383   :  { %p489_p5 = scmp.ne.s32.totalorder %s683_s6, %s488_s23  ;;  %p492_p6 = scmp.lt.u32.totalorder %s488_s23, %s683_s6 }
 0x385   :  { %p494_p7 = pnand %p492_p6, %p489_p5 }
 0x387   :  { %497 = shalt.err (!%p494_p7)
}
 0x388   :  { %s503_s28 = smov 128   ;;  %s504_s29 = smov 8  }
 0x389   :  { %428 = dma.vmem_to_hbm [thread:$0]  %s423_s19, 512, %s683_s6, [#allocation4], %s503_s28, %s503_s28, %s504_s29  }
 0x38a   :  { %498 = dma.done.wait [#allocation4], 512  }
 0x38b   :  { %499 = vsyncadd [#allocation4], 4294966784 }
 0x38c   :  { %432 = vsyncpa [#allocation4], 1 }

</bundles_post_ra>
